<compile_context>
chip_gen: v7x
topology: tpu7x:2x2x1
jax: 0.10.0
libtpu: 0.0.40
codegen_flags: <defaults>
</compile_context>

<pallas_src>
import jax
import jax.numpy as jnp
from jax.experimental import pallas as pl
from jax.experimental.pallas import tpu as pltpu

# Natural and lane-padded feature dims.
IN_DIM, H1_DIM, H2_DIM, OUT_DIM = 28 * 28, 200, 100, 10
H1_PAD, H2_PAD, OUT_PAD = 256, 128, 128
NEG_INF = -1e30
MAX_TM = 1024  # rows per batch tile (cap)


def _cdiv(a, b):
    return -(-a // b)


def _round_up(n, m):
    return _cdiv(n, m) * m


def _tile_batch(batch):
    """Pick batch tile TM (multiple of 16 for bf16 output tiling, <=1024 rows)
    and the padded batch size.  For batch >= 32 force >=2 grid steps so the
    'parallel' axis can shard across v7x's two TensorCores."""
    rows = _round_up(batch, 16)
    steps = max(_cdiv(rows, MAX_TM), 2 if rows >= 32 else 1)
    tm = _round_up(_cdiv(rows, steps), 16)
    b_pad = _round_up(rows, tm)
    return tm, b_pad


def mlp_softmax_kernel(x_ref, w1_ref, b1_ref, w2_ref, b2_ref, w3_ref, b3_ref,
                       o_ref):
    # Cast x to bf16 in-kernel (saves a separate wrapper-side HBM pass).
    x = x_ref[...].astype(jnp.bfloat16)

    # ---- Linear(784->200) [out-dim padded to 256] + ReLU ----
    h1 = jnp.dot(x, w1_ref[...], preferred_element_type=jnp.float32)
    h1 = jnp.maximum(h1 + b1_ref[...], 0.0)

    # ---- Linear(200->100) [padded 256->128] + ReLU ----
    h2 = jnp.dot(h1.astype(jnp.bfloat16), w2_ref[...],
                 preferred_element_type=jnp.float32)
    h2 = jnp.maximum(h2 + b2_ref[...], 0.0)

    # ---- Dropout(p=0.5): eval-mode identity ----
    # TODO(synk): training-mode dropout would use pltpu.prng_seed +
    # pltpu.prng_random_bits to build a Bernoulli mask and scale by 1/(1-p).

    # ---- Linear(100->10) [padded 128->128] ----
    # b3's pad lanes (10..127) hold -1e30, so padded logits drop out of the
    # softmax automatically (w3's pad columns are zero).
    logits = jnp.dot(h2.astype(jnp.bfloat16), w3_ref[...],
                     preferred_element_type=jnp.float32)
    logits = logits + b3_ref[...]

    # ---- Softmax along dim=1 (numerically stable, exact normalization) ----
    m = jnp.max(logits, axis=-1, keepdims=True)
    e = jnp.exp(logits - m)
    denom = jnp.sum(e, axis=-1, keepdims=True)
    o_ref[...] = (e / denom).astype(o_ref.dtype)


def prepare_params(w1, b1, w2, b2, w3, b3):
    """Pad/cast weights once at model-load time (hoisted out of the forward)."""
    w1p = jnp.pad(w1, ((0, 0), (0, H1_PAD - H1_DIM))).astype(jnp.bfloat16)
    b1p = jnp.pad(b1, ((0, 0), (0, H1_PAD - H1_DIM)))
    w2p = jnp.pad(w2, ((0, H1_PAD - H1_DIM), (0, H2_PAD - H2_DIM))).astype(jnp.bfloat16)
    b2p = jnp.pad(b2, ((0, 0), (0, H2_PAD - H2_DIM)))
    w3p = jnp.pad(w3, ((0, H2_PAD - H2_DIM), (0, OUT_PAD - OUT_DIM))).astype(jnp.bfloat16)
    # -1e30 in the pad lanes -> padded logits are masked without in-kernel work.
    b3p = jnp.pad(b3, ((0, 0), (0, OUT_PAD - OUT_DIM)), constant_values=NEG_INF)
    return w1p, b1p, w2p, b2p, w3p, b3p


@jax.jit
def nn_forward(x, w1p, b1p, w2p, b2p, w3p, b3p):
    """x: (B, 784) f32.  w*p/b*p: pre-padded params from prepare_params."""
    B = x.shape[0]
    TM, B_pad = _tile_batch(B)
    grid = B_pad // TM

    # Only the batch rows are padded; x stays f32 and is cast in-kernel.
    xp = x if B_pad == B else jnp.pad(x, ((0, B_pad - B), (0, 0)))

    out_padded = pl.pallas_call(
        mlp_softmax_kernel,
        out_shape=jax.ShapeDtypeStruct((B_pad, OUT_PAD), jnp.bfloat16),
        grid_spec=pltpu.PrefetchScalarGridSpec(
            num_scalar_prefetch=0,
            grid=(grid,),
            in_specs=[
                # Activation tile marches over the batch (full 784 last dim).
                pl.BlockSpec((TM, IN_DIM), lambda i: (i, 0)),
                # Weights / biases resident (same block every step).
                pl.BlockSpec((IN_DIM, H1_PAD), lambda i: (0, 0)),
                pl.BlockSpec((1, H1_PAD), lambda i: (0, 0)),
                pl.BlockSpec((H1_PAD, H2_PAD), lambda i: (0, 0)),
                pl.BlockSpec((1, H2_PAD), lambda i: (0, 0)),
                pl.BlockSpec((H2_PAD, OUT_PAD), lambda i: (0, 0)),
                pl.BlockSpec((1, OUT_PAD), lambda i: (0, 0)),
            ],
            out_specs=pl.BlockSpec((TM, OUT_PAD), lambda i: (i, 0)),
        ),
        compiler_params=pltpu.CompilerParams(
            dimension_semantics=("parallel",),
            vmem_limit_bytes=32 << 20,
        ),
    )(xp, w1p, b1p, w2p, b2p, w3p, b3p)

    # Slice off batch padding and the 118 pad lanes; return f32 to consumers.
    return out_padded[:B, :OUT_DIM].astype(jnp.float32)


def init_linear(key, fan_in, fan_out):
    # Mimic PyTorch default init: U(-1/sqrt(fan_in), +1/sqrt(fan_in)).
    kw, kb = jax.random.split(key)
    bound = 1.0 / jnp.sqrt(jnp.float32(fan_in))
    w = jax.random.uniform(kw, (fan_in, fan_out), jnp.float32, -bound, bound)
    b = jax.random.uniform(kb, (1, fan_out), jnp.float32, -bound, bound)
    return w, b


def reference_forward(x, w1, b1, w2, b2, w3, b3):
    h1 = jnp.maximum(x @ w1 + b1, 0.0)
    h2 = jnp.maximum(h1 @ w2 + b2, 0.0)
    logits = h2 @ w3 + b3
    return jax.nn.softmax(logits, axis=-1)


if __name__ == "__main__":
    key = jax.random.PRNGKey(0)
    kx, k1, k2, k3 = jax.random.split(key, 4)

    B = 8  # small batch
    x = jax.random.normal(kx, (B, IN_DIM), jnp.float32)

    w1, b1 = init_linear(k1, IN_DIM, H1_DIM)
    w2, b2 = init_linear(k2, H1_DIM, H2_DIM)
    w3, b3 = init_linear(k3, H2_DIM, OUT_DIM)

    params = prepare_params(w1, b1, w2, b2, w3, b3)  # once, at "load" time

    out = nn_forward(x, *params)
    out = jax.block_until_ready(out)

    # Sanity: shape, softmax rows sum to ~1 (exact divide in-kernel; bf16
    # output rounding keeps sums within ~2e-3), and agreement with a pure-JAX
    # f32 reference (bf16 MXU inputs -> relaxed tolerance).
    assert out.shape == (B, OUT_DIM)
    assert jnp.allclose(jnp.sum(out, axis=-1), 1.0, atol=1e-2)
    ref = reference_forward(x, w1, b1, w2, b2, w3, b3)
    assert jnp.allclose(out, ref, atol=5e-2)

    print("KERNEL_OK")
</pallas_src>

<mosaic_0001>
module attributes {stable_mosaic.version = 11 : i64} {
  func.func @mlp_softmax_kernel(%arg0: i32, %arg1: memref<16x784xf32, #tpu.memory_space<vmem>>, %arg2: memref<784x256xbf16, #tpu.memory_space<vmem>>, %arg3: memref<1x256xf32, #tpu.memory_space<vmem>>, %arg4: memref<256x128xbf16, #tpu.memory_space<vmem>>, %arg5: memref<1x128xf32, #tpu.memory_space<vmem>>, %arg6: memref<128x128xbf16, #tpu.memory_space<vmem>>, %arg7: memref<1x128xf32, #tpu.memory_space<vmem>>, %arg8: memref<16x128xbf16, #tpu.memory_space<vmem>>) attributes {dimension_semantics = [#tpu.dimension_semantics<parallel>], iteration_bounds = array<i64: 1>, scalar_prefetch = 0 : i64, scratch_operands = 0 : i64, tpu.core_type = #tpu.core_type<tc>, window_params = [{transform_indices = @transform_0, window_bounds = array<i64: 16, 784>}, {pipeline_mode = #tpu.pipeline_mode<synchronous>, transform_indices = @transform_1, window_bounds = array<i64: 784, 256>}, {pipeline_mode = #tpu.pipeline_mode<synchronous>, transform_indices = @transform_2, window_bounds = array<i64: 1, 256>}, {pipeline_mode = #tpu.pipeline_mode<synchronous>, transform_indices = @transform_3, window_bounds = array<i64: 256, 128>}, {pipeline_mode = #tpu.pipeline_mode<synchronous>, transform_indices = @transform_4, window_bounds = array<i64: 1, 128>}, {pipeline_mode = #tpu.pipeline_mode<synchronous>, transform_indices = @transform_5, window_bounds = array<i64: 128, 128>}, {pipeline_mode = #tpu.pipeline_mode<synchronous>, transform_indices = @transform_6, window_bounds = array<i64: 1, 128>}, {transform_indices = @transform_7, window_bounds = array<i64: 16, 128>}]} {
    %c0 = arith.constant 0 : index
    %c0_0 = arith.constant 0 : index
    %0 = vector.load %arg1[%c0, %c0_0] : memref<16x784xf32, #tpu.memory_space<vmem>>, vector<16x784xf32>
    %1 = arith.truncf %0 : vector<16x784xf32> to vector<16x784xbf16>
    %c0_1 = arith.constant 0 : index
    %c0_2 = arith.constant 0 : index
    %2 = vector.load %arg2[%c0_1, %c0_2] : memref<784x256xbf16, #tpu.memory_space<vmem>>, vector<784x256xbf16>
    %cst = arith.constant dense<0.000000e+00> : vector<16x256xf32>
    %3 = tpu.matmul %1, %2, %cst {dimension_numbers = #tpu.dot_dimension_numbers<[1], [0], [0], [1], [0, 0, 1, 1], [], []>} : vector<16x784xbf16>, vector<784x256xbf16>, vector<16x256xf32> -> vector<16x256xf32>
    %c0_3 = arith.constant 0 : index
    %c0_4 = arith.constant 0 : index
    %4 = vector.load %arg3[%c0_3, %c0_4] : memref<1x256xf32, #tpu.memory_space<vmem>>, vector<1x256xf32>
    %5 = vector.broadcast %4 : vector<1x256xf32> to vector<16x256xf32>
    %6 = arith.addf %3, %5 : vector<16x256xf32>
    %cst_5 = arith.constant 0.000000e+00 : f32
    %7 = vector.broadcast %cst_5 : f32 to vector<16x256xf32>
    %8 = arith.maximumf %6, %7 : vector<16x256xf32>
    %9 = arith.truncf %8 : vector<16x256xf32> to vector<16x256xbf16>
    %c0_6 = arith.constant 0 : index
    %c0_7 = arith.constant 0 : index
    %10 = vector.load %arg4[%c0_6, %c0_7] : memref<256x128xbf16, #tpu.memory_space<vmem>>, vector<256x128xbf16>
    %cst_8 = arith.constant dense<0.000000e+00> : vector<16x128xf32>
    %11 = tpu.matmul %9, %10, %cst_8 {dimension_numbers = #tpu.dot_dimension_numbers<[1], [0], [0], [1], [0, 0, 1, 1], [], []>} : vector<16x256xbf16>, vector<256x128xbf16>, vector<16x128xf32> -> vector<16x128xf32>
    %c0_9 = arith.constant 0 : index
    %c0_10 = arith.constant 0 : index
    %12 = vector.load %arg5[%c0_9, %c0_10] : memref<1x128xf32, #tpu.memory_space<vmem>>, vector<1x128xf32>
    %13 = vector.broadcast %12 : vector<1x128xf32> to vector<16x128xf32>
    %14 = arith.addf %11, %13 : vector<16x128xf32>
    %cst_11 = arith.constant 0.000000e+00 : f32
    %15 = vector.broadcast %cst_11 : f32 to vector<16x128xf32>
    %16 = arith.maximumf %14, %15 : vector<16x128xf32>
    %17 = arith.truncf %16 : vector<16x128xf32> to vector<16x128xbf16>
    %c0_12 = arith.constant 0 : index
    %c0_13 = arith.constant 0 : index
    %18 = vector.load %arg6[%c0_12, %c0_13] : memref<128x128xbf16, #tpu.memory_space<vmem>>, vector<128x128xbf16>
    %cst_14 = arith.constant dense<0.000000e+00> : vector<16x128xf32>
    %19 = tpu.matmul %17, %18, %cst_14 {dimension_numbers = #tpu.dot_dimension_numbers<[1], [0], [0], [1], [0, 0, 1, 1], [], []>} : vector<16x128xbf16>, vector<128x128xbf16>, vector<16x128xf32> -> vector<16x128xf32>
    %c0_15 = arith.constant 0 : index
    %c0_16 = arith.constant 0 : index
    %20 = vector.load %arg7[%c0_15, %c0_16] : memref<1x128xf32, #tpu.memory_space<vmem>>, vector<1x128xf32>
    %21 = vector.broadcast %20 : vector<1x128xf32> to vector<16x128xf32>
    %22 = arith.addf %19, %21 : vector<16x128xf32>
    %cst_17 = arith.constant dense<0xFF800000> : vector<16xf32>
    %23 = vector.multi_reduction <maximumf>, %22, %cst_17 [1] : vector<16x128xf32> to vector<16xf32>
    %24 = vector.shape_cast %23 : vector<16xf32> to vector<16x1xf32>
    %25 = vector.broadcast %24 : vector<16x1xf32> to vector<16x128xf32>
    %26 = arith.subf %22, %25 : vector<16x128xf32>
    %27 = math.exp %26 : vector<16x128xf32>
    %cst_18 = arith.constant dense<0.000000e+00> : vector<16xf32>
    %28 = vector.multi_reduction <add>, %27, %cst_18 [1] : vector<16x128xf32> to vector<16xf32>
    %29 = vector.shape_cast %28 : vector<16xf32> to vector<16x1xf32>
    %30 = vector.broadcast %29 : vector<16x1xf32> to vector<16x128xf32>
    %31 = arith.divf %27, %30 : vector<16x128xf32>
    %32 = arith.truncf %31 : vector<16x128xf32> to vector<16x128xbf16>
    %c0_19 = arith.constant 0 : index
    %c0_20 = arith.constant 0 : index
    %33 = vector.load %arg8[%c0_19, %c0_20] : memref<16x128xbf16, #tpu.memory_space<vmem>>, vector<16x128xbf16>
    tpu.vector_store %arg8[%c0_19, %c0_20], %32 {strides = array<i32>} : memref<16x128xbf16, #tpu.memory_space<vmem>>, vector<16x128xbf16>,
    return
  }
  func.func @transform_0(%arg0: i32) -> (i32, i32) {
    %c0_i32 = arith.constant 0 : i32
    %c0_i32_0 = arith.constant 0 : i32
    return %arg0, %c0_i32 : i32, i32
  }
  func.func @transform_1(%arg0: i32) -> (i32, i32) {
    %c0_i32 = arith.constant 0 : i32
    %c0_i32_0 = arith.constant 0 : i32
    %c0_i32_1 = arith.constant 0 : i32
    return %c0_i32, %c0_i32_0 : i32, i32
  }
  func.func @transform_2(%arg0: i32) -> (i32, i32) {
    %c0_i32 = arith.constant 0 : i32
    %c0_i32_0 = arith.constant 0 : i32
    %c0_i32_1 = arith.constant 0 : i32
    return %c0_i32, %c0_i32_0 : i32, i32
  }
  func.func @transform_3(%arg0: i32) -> (i32, i32) {
    %c0_i32 = arith.constant 0 : i32
    %c0_i32_0 = arith.constant 0 : i32
    %c0_i32_1 = arith.constant 0 : i32
    return %c0_i32, %c0_i32_0 : i32, i32
  }
  func.func @transform_4(%arg0: i32) -> (i32, i32) {
    %c0_i32 = arith.constant 0 : i32
    %c0_i32_0 = arith.constant 0 : i32
    %c0_i32_1 = arith.constant 0 : i32
    return %c0_i32, %c0_i32_0 : i32, i32
  }
  func.func @transform_5(%arg0: i32) -> (i32, i32) {
    %c0_i32 = arith.constant 0 : i32
    %c0_i32_0 = arith.constant 0 : i32
    %c0_i32_1 = arith.constant 0 : i32
    return %c0_i32, %c0_i32_0 : i32, i32
  }
  func.func @transform_6(%arg0: i32) -> (i32, i32) {
    %c0_i32 = arith.constant 0 : i32
    %c0_i32_0 = arith.constant 0 : i32
    %c0_i32_1 = arith.constant 0 : i32
    return %c0_i32, %c0_i32_0 : i32, i32
  }
  func.func @transform_7(%arg0: i32) -> (i32, i32) {
    %c0_i32 = arith.constant 0 : i32
    %c0_i32_0 = arith.constant 0 : i32
    return %arg0, %c0_i32 : i32, i32
  }
}

</mosaic_0001>

<bundles_post_ra>
// kernel: nn_forward.1
= control target key start
LH: loop header
LB: loop body
LE: loop exit
PB: predicated region body
PF: predicated region fallthrough
CT: control target
= control target key end

     0   :  { %12 = vsyncpa [#allocation3], 0  ;;  %s1795_s0 = inlined_call_operand.vmem [shape: f32[16,784], index: 0, kind: input, shape index: {}]   ;;  %s1796_s1 = inlined_call_operand.hbm [shape: bf16[784,256], index: 1, kind: input, shape index: {}]   ;;  %s1797_s2 = inlined_call_operand.vmem [shape: f32[1,256], index: 2, kind: input, shape index: {}]   ;;  %s1798_s3 = inlined_call_operand.vmem [shape: bf16[256,128], index: 3, kind: input, shape index: {}]   ;;  %s1799_s4 = inlined_call_operand.vmem [shape: f32[1,128], index: 4, kind: input, shape index: {}]   ;;  %s1800_s5 = inlined_call_operand.hbm [shape: bf16[128,128], index: 5, kind: input, shape index: {}]   ;;  %s1801_s6 = inlined_call_operand.vmem [shape: f32[1,128], index: 6, kind: input, shape index: {}]   ;;  %s1802_s7 = inlined_call_operand.vmem [shape: bf16[16,128], index: 7, kind: output, shape index: {}]  }
   0x1   :  { %13 = vsyncpa [#allocation5], 0  ;;  %s1620_s24 = smov [#allocation2]   ;;  %s1572_s28 = scalar_lea.hbm %s1796_s1, 12544 }
   0x2   :  { %s21_s25 = sshll.u32 %s1620_s24, 4  ;;  %p1573_p0 = scmp.ne.s32.totalorder %s1796_s1, %s1572_s28  ;;  %s22_s25 = int_to_ptr.vmem [resolvable:$true] %s21_s25 }
   0x3   :  { %p1576_p1 = scmp.lt.u32.totalorder %s1572_s28, %s1796_s1 }
   0x5   :  { %p1578_p2 = pnand %p1576_p1, %p1573_p0 }
   0x7   :  { %1581 = shalt.err (!%p1578_p2)
}
   0x8   :  { %s1582_s10 = scalar_lea.vmem %s22_s25, 12544  ;;  %p1587_p4 = scmp.lt.s32.totalorder %s22_s25, %s22_s25 }
   0x9   :  { %p1583_p3 = scmp.ne.s32.totalorder %s22_s25, %s1582_s10  ;;  %p1588_p5 = scmp.lt.s32.totalorder %s1582_s10, %s1582_s10 }
   0xb   :  { %p1589_p6 = por %p1588_p5, %p1587_p4 }
   0xd   :  { %p1590_p7 = pnand %p1589_p6, %p1583_p3 }
   0xf   :  { %1593 = shalt.err (!%p1590_p7)
}
  0x10   :  { %s1621_s11 = smov 128   ;;  %s1622_s12 = smov 8  }
  0x11   :  { %27 = dma.hbm_to_vmem [thread:$0]  %s1796_s1, 12544, %s22_s25, [#allocation3], %s1621_s11, %s1621_s11, %s1622_s12  }
  0x12   :  { %s1623_s15 = smov [#allocation4]   ;;  %s1594_s19 = scalar_lea.hbm %s1800_s5, 1024 }
  0x13   :  { %s39_s16 = sshll.u32 %s1623_s15, 4  ;;  %p1595_p8 = scmp.ne.s32.totalorder %s1800_s5, %s1594_s19  ;;  %s40_s16 = int_to_ptr.vmem [resolvable:$true] %s39_s16 }
  0x14   :  { %p1598_p9 = scmp.lt.u32.totalorder %s1594_s19, %s1800_s5 }
  0x16   :  { %p1600_p10 = pnand %p1598_p9, %p1595_p8 }
  0x18   :  { %1603 = shalt.err (!%p1600_p10)
}
  0x19   :  { %s1604_s24 = scalar_lea.vmem %s40_s16, 1024  ;;  %p1609_p12 = scmp.lt.s32.totalorder %s40_s16, %s40_s16 }
  0x1a   :  { %p1605_p11 = scmp.ne.s32.totalorder %s40_s16, %s1604_s24  ;;  %p1610_p13 = scmp.lt.s32.totalorder %s1604_s24, %s1604_s24 }
  0x1c   :  { %p1611_p0 = por %p1610_p13, %p1609_p12 }
  0x1e   :  { %p1612_p1 = pnand %p1611_p0, %p1605_p11 }
  0x20   :  { %1615 = shalt.err (!%p1612_p1)
}
  0x21   :  { %s1624_s1 = smov 64   ;;  %s1625_s25 = smov 4  }
  0x22   :  { %45 = dma.hbm_to_vmem [thread:$0]  %s1800_s5, 1024, %s40_s16, [#allocation5], %s1624_s1, %s1624_s1, %s1625_s25  }
  0x23   :  { %1616 = dma.done.wait [#allocation3], 12544  }
  0x24   :  { %1617 = vsyncadd [#allocation3], 4294954752 }
  0x25   :  { %1618 = dma.done.wait [#allocation5], 1024  }
  0x26   :  { %1619 = vsyncadd [#allocation5], 4294966272  ;;  %v1393_v0 = vld [vmem:[#allocation2 + $0x104] ss:$8 sps:$4 sm:$0xff]   ;;  %v1395_v1 = vld [vmem:[#allocation2 + $0x100] ss:$8 sps:$4 sm:$0xff]  }
  0x27   :  { %723 = vmatprep.subr.bf16.mxu0 %v1393_v0  ;;  %v1396_v2 = vld [vmem:[#allocation2 + $0x114] ss:$8 sps:$4 sm:$0xff]   ;;  %v1398_v3 = vld [vmem:[#allocation2 + $0x110] ss:$8 sps:$4 sm:$0xff]   ;;  %v1399_v4 = vld [vmem:[#allocation2 + $0x124] ss:$8 sps:$4 sm:$0xff]  }
  0x28   :  { %724 = vmatpush1.bf16.msra.mxu0 %v1395_v1  ;;  %v1401_v5 = vld [vmem:[#allocation2 + $0x120] ss:$8 sps:$4 sm:$0xff]   ;;  %v1402_v6 = vld [vmem:[#allocation2 + $0x134] ss:$8 sps:$4 sm:$0xff]   ;;  %v1404_v7 = vld [vmem:[#allocation2 + $0x130] ss:$8 sps:$4 sm:$0xff]  }
  0x29   :  { %725 = vmatprep.subr.bf16.mxu0 %v1396_v2  ;;  %v1405_v8 = vld [vmem:[#allocation2 + $0x144] ss:$8 sps:$4 sm:$0xff]   ;;  %v1407_v9 = vld [vmem:[#allocation2 + $0x140] ss:$8 sps:$4 sm:$0xff]   ;;  %v1408_v10 = vld [vmem:[#allocation2 + $0x154] ss:$8 sps:$4 sm:$0xff]  }
  0x2a   :  { %v1410_v11 = vld [vmem:[#allocation2 + $0x150] ss:$8 sps:$4 sm:$0xff]   ;;  %v1411_v12 = vld [vmem:[#allocation2 + $0x164] ss:$8 sps:$4 sm:$0xff]   ;;  %v1413_v16 = vld [vmem:[#allocation2 + $0x160] ss:$8 sps:$4 sm:$0xff]  }
  0x2b   :  { %v58_v13 = vld [vmem:[%s1795_s0 + $0x18] sm:$0xff]  ;;  %v65_v14 = vld [vmem:[%s1795_s0 + $0x50] sm:$0xff]  ;;  %v1447_v18 = vld [vmem:[#allocation2 + $0x4] ss:$8 sps:$4 sm:$0xff]   ;;  %vm676_vm0 = vcmask 130048   ;;  %vm1628_vm1 = vmmov 0  }
  0x2c   :  { %726 = vmatpush1.bf16.msra.mxu0 %v1398_v3  ;;  %v72_v15 = vpack.c.bf16 %v65_v14, %v58_v13  ;;  %v1414_v17 = vld [vmem:[#allocation2 + $0x174] ss:$8 sps:$4 sm:$0xff]   ;;  %v1416_v19 = vld [vmem:[#allocation2 + $0x170] ss:$8 sps:$4 sm:$0xff]   ;;  %v1417_v20 = vld [vmem:[#allocation2 + $0x184] ss:$8 sps:$4 sm:$0xff]   ;;  %680 = vmatprep.subr.bf16.mxu1 %v1447_v18 }
  0x2d   :  { %727 = vmatprep.subr.bf16.mxu0 %v1399_v4  ;;  %v1452_v21 = vld [vmem:[#allocation2] ss:$8 sps:$4 sm:$0xff]   ;;  %v1453_v22 = vld [vmem:[#allocation2 + $0x14] ss:$8 sps:$4 sm:$0xff]   ;;  %v1458_v24 = vld [vmem:[#allocation2 + $0x10] ss:$8 sps:$4 sm:$0xff]  }
  0x2e   :  { %755 = vmatprep.mubr.bf16.mxu0 %v72_v15  ;;  %681 = vmatpush1.bf16.msra.mxu1 %v1452_v21  ;;  %v1419_v23 = vld [vmem:[#allocation2 + $0x180] ss:$8 sps:$4 sm:$0xff]   ;;  %v1459_v25 = vld [vmem:[#allocation2 + $0x24] ss:$8 sps:$4 sm:$0xff]   ;;  %v1420_v26 = vld [vmem:[#allocation2 + $0x194] ss:$8 sps:$4 sm:$0xff]  }
  0x2f   :  { %682 = vmatprep.subr.bf16.mxu1 %v1453_v22  ;;  %v1464_v27 = vld [vmem:[#allocation2 + $0x20] ss:$8 sps:$4 sm:$0xff]   ;;  %v1465_v28 = vld [vmem:[#allocation2 + $0x34] ss:$8 sps:$4 sm:$0xff]   ;;  %v1422_v29 = vld [vmem:[#allocation2 + $0x190] ss:$8 sps:$4 sm:$0xff]  }
  0x30   :  { %728 = vmatpush1.bf16.msra.mxu0 %v1401_v5  ;;  %v1423_v30 = vld [vmem:[#allocation2 + $0x1a4] ss:$8 sps:$4 sm:$0xff]   ;;  %v1470_v31 = vld [vmem:[#allocation2 + $0x30] ss:$8 sps:$4 sm:$0xff]   ;;  %v1425_v33 = vld [vmem:[#allocation2 + $0x1a0] ss:$8 sps:$4 sm:$0xff]  }
  0x31   :  { %729 = vmatprep.subr.bf16.mxu0 %v1402_v6  ;;  %v1471_v32 = vld [vmem:[#allocation2 + $0x44] ss:$8 sps:$4 sm:$0xff]   ;;  %v1426_v34 = vld [vmem:[#allocation2 + $0x1b4] ss:$8 sps:$4 sm:$0xff]   ;;  %v1476_v35 = vld [vmem:[#allocation2 + $0x40] ss:$8 sps:$4 sm:$0xff]  }
  0x32   :  { %683 = vmatpush1.bf16.msra.mxu1 %v1458_v24  ;;  %v1477_v36 = vld [vmem:[#allocation2 + $0x54] ss:$8 sps:$4 sm:$0xff]   ;;  %v1428_v37 = vld [vmem:[#allocation2 + $0x1b0] ss:$8 sps:$4 sm:$0xff]   ;;  %v1429_v38 = vld [vmem:[#allocation2 + $0x1c4] ss:$8 sps:$4 sm:$0xff]  }
  0x33   :  { %684 = vmatprep.subr.bf16.mxu1 %v1459_v25  ;;  %v1482_v39 = vld [vmem:[#allocation2 + $0x50] ss:$8 sps:$4 sm:$0xff]   ;;  %v1483_v40 = vld [vmem:[#allocation2 + $0x64] ss:$8 sps:$4 sm:$0xff]   ;;  %v1431_v41 = vld [vmem:[#allocation2 + $0x1c0] ss:$8 sps:$4 sm:$0xff]  }
  0x34   :  { %730 = vmatpush1.bf16.msra.mxu0 %v1404_v7  ;;  %v1432_v42 = vld [vmem:[#allocation2 + $0x1d4] ss:$8 sps:$4 sm:$0xff]   ;;  %v1488_v43 = vld [vmem:[#allocation2 + $0x60] ss:$8 sps:$4 sm:$0xff]   ;;  %v1434_v45 = vld [vmem:[#allocation2 + $0x1d0] ss:$8 sps:$4 sm:$0xff]  }
  0x35   :  { %731 = vmatprep.subr.bf16.mxu0 %v1405_v8  ;;  %v1489_v44 = vld [vmem:[#allocation2 + $0x74] ss:$8 sps:$4 sm:$0xff]   ;;  %v1435_v46 = vld [vmem:[#allocation2 + $0x1e4] ss:$8 sps:$4 sm:$0xff]   ;;  %v1494_v47 = vld [vmem:[#allocation2 + $0x70] ss:$8 sps:$4 sm:$0xff]  }
  0x36   :  { %685 = vmatpush1.bf16.msra.mxu1 %v1464_v27  ;;  %v1495_v48 = vld [vmem:[#allocation2 + $0x84] ss:$8 sps:$4 sm:$0xff]   ;;  %v1437_v49 = vld [vmem:[#allocation2 + $0x1e0] ss:$8 sps:$4 sm:$0xff]   ;;  %v1438_v50 = vld [vmem:[#allocation2 + $0x1f4] ss:$8 sps:$4 sm:$0xff]  }
  0x37   :  { %686 = vmatprep.subr.bf16.mxu1 %v1465_v28  ;;  %v1500_v51 = vld [vmem:[#allocation2 + $0x80] ss:$8 sps:$4 sm:$0xff]   ;;  %v1501_v52 = vld [vmem:[#allocation2 + $0x94] ss:$8 sps:$4 sm:$0xff]   ;;  %v1440_v53 = vld [vmem:[#allocation2 + $0x1f0] ss:$8 sps:$4 sm:$0xff]  }
  0x38   :  { %732 = vmatpush1.bf16.msra.mxu0 %v1407_v9  ;;  %v57_v54 = vld [vmem:[%s1795_s0 + $0x10] sm:$0xff]  ;;  %v64_v55 = vld [vmem:[%s1795_s0 + $0x48] sm:$0xff]  ;;  %v67_v62 = vld [vmem:[%s1795_s0 + $0x60] sm:$0xff] }
  0x39   :  { %733 = vmatprep.subr.bf16.mxu0 %v1408_v10  ;;  %v1443_v56 = vld [vmem:[#allocation2 + $0x204] ss:$8 sps:$4 sm:$0xff]   ;;  %v1506_v57 = vld [vmem:[#allocation2 + $0x90] ss:$8 sps:$4 sm:$0xff]   ;;  %v1441_v58 = vld [vmem:[#allocation2 + $0x200] ss:$8 sps:$4 sm:$0xff]   ;;  %v71_v59 = vpack.c.bf16 %v64_v55, %v57_v54 }
  0x3a   :  { %687 = vmatpush1.bf16.msra.mxu1 %v1470_v31  ;;  %v1507_v60 = vld [vmem:[#allocation2 + $0xa4] ss:$8 sps:$4 sm:$0xff]   ;;  %v1446_v63 = vld [vmem:[#allocation2 + $0x214] ss:$8 sps:$4 sm:$0xff]   ;;  %v1512_v1 = vld [vmem:[#allocation2 + $0xa0] ss:$8 sps:$4 sm:$0xff]  }
  0x3b   :  { %688 = vmatprep.subr.bf16.mxu1 %v1471_v32  ;;  %v60_v61 = vld [vmem:[%s1795_s0 + $0x28] sm:$0xff]  ;;  %v1513_v2 = vld [vmem:[#allocation2 + $0xb4] ss:$8 sps:$4 sm:$0xff]   ;;  %v1444_v3 = vld [vmem:[#allocation2 + $0x210] ss:$8 sps:$4 sm:$0xff]  }
  0x3c   :  { %734 = vmatpush1.bf16.msra.mxu0 %v1410_v11  ;;  %v74_v0 = vpack.c.bf16 %v67_v62, %v60_v61  ;;  %v1451_v4 = vld [vmem:[#allocation2 + $0x224] ss:$8 sps:$4 sm:$0xff]   ;;  %v1518_v7 = vld [vmem:[#allocation2 + $0xb0] ss:$8 sps:$4 sm:$0xff]   ;;  %v1449_v10 = vld [vmem:[#allocation2 + $0x220] ss:$8 sps:$4 sm:$0xff]  }
  0x3d   :  { %735 = vmatprep.subr.bf16.mxu0 %v1411_v12  ;;  %v56_v5 = vld [vmem:[%s1795_s0 + $0x8] sm:$0xff]  ;;  %v63_v6 = vld [vmem:[%s1795_s0 + $0x40] sm:$0xff]  ;;  %v1457_v11 = vld [vmem:[#allocation2 + $0x234] ss:$8 sps:$4 sm:$0xff]   ;;  %v1626_v61 = vmov 0  }
  0x3e   :  { %689 = vmatpush1.bf16.msra.mxu1 %v1476_v35  ;;  %v70_v8 = vpack.c.bf16 %v63_v6, %v56_v5  ;;  %v1519_v9 = vld [vmem:[#allocation2 + $0xc4] ss:$8 sps:$4 sm:$0xff]   ;;  %v1524_v12 = vld [vmem:[#allocation2 + $0xc0] ss:$8 sps:$4 sm:$0xff]   ;;  %v1525_v13 = vld [vmem:[#allocation2 + $0xd4] ss:$8 sps:$4 sm:$0xff]  }
  0x3f   :  { %690 = vmatprep.subr.bf16.mxu1 %v1477_v36  ;;  %v1455_v14 = vld [vmem:[#allocation2 + $0x230] ss:$8 sps:$4 sm:$0xff]   ;;  %v1463_v15 = vld [vmem:[#allocation2 + $0x244] ss:$8 sps:$4 sm:$0xff]   ;;  %v1469_v18 = vld [vmem:[#allocation2 + $0x254] ss:$8 sps:$4 sm:$0xff]  }
  0x40   :  { %736 = vmatpush1.bf16.msra.mxu0 %v1413_v16  ;;  %712 = vmatprep.mubr.bf16.mxu1 %v70_v8  ;;  %v1461_v16 = vld [vmem:[#allocation2 + $0x240] ss:$8 sps:$4 sm:$0xff]   ;;  %v1537_v21 = vld [vmem:[#allocation2 + $0xf4] ss:$8 sps:$4 sm:$0xff]   ;;  %v1467_v22 = vld [vmem:[#allocation2 + $0x250] ss:$8 sps:$4 sm:$0xff]  }
  0x41   :  { %737 = vmatprep.subr.bf16.mxu0 %v1414_v17  ;;  %v1530_v17 = vld [vmem:[#allocation2 + $0xd0] ss:$8 sps:$4 sm:$0xff]   ;;  %v55_v25 = vld [vmem:[%s1795_s0] sm:$0xff]  ;;  %v1542_v32 = vld [vmem:[%s1798_s3 + $0x48] sm:$0xff]   ;;  %v1627_v8 = vmov 0.0  }
  0x42   :  { %691 = vmatpush1.bf16.msra.mxu1 %v1482_v39  ;;  %v1539_v24 = vld [vmem:[#allocation2 + $0xf0] ss:$8 sps:$4 sm:$0xff]   ;;  %v1540_v27 = vld [vmem:[%s1798_s3 + $0x40] sm:$0xff]   ;;  %v1543_v35 = vld [vmem:[%s1798_s3 + $0x8] sm:$0xff]  }
  0x43   :  { %692 = vmatprep.subr.bf16.mxu1 %v1483_v40  ;;  %v1473_v28 = vld [vmem:[#allocation2 + $0x260] ss:$8 sps:$4 sm:$0xff]   ;;  %v1544_v36 = vld [vmem:[%s1798_s3 + $0x50] sm:$0xff]   ;;  %v1546_v40 = vld [vmem:[%s1798_s3 + $0x58] sm:$0xff]  }
  0x44   :  { %738 = vmatpush1.bf16.msra.mxu0 %v1416_v19  ;;  %v1531_v19 = vld [vmem:[#allocation2 + $0xe4] ss:$8 sps:$4 sm:$0xff]   ;;  %v1545_v39 = vld [vmem:[%s1798_s3 + $0x10] sm:$0xff]   ;;  %v1554_v6 = vld [vmem:[%s1798_s3 + $0x78] sm:$0xff]  }
  0x45   :  { %739 = vmatprep.subr.bf16.mxu0 %v1417_v20  ;;  %v1536_v20 = vld [vmem:[#allocation2 + $0xe0] ss:$8 sps:$4 sm:$0xff]   ;;  %v1529_v54 = vld [vmem:[#allocation2 + $0x2f4] ss:$8 sps:$4 sm:$0xff]   ;;  %v1527_v55 = vld [vmem:[#allocation2 + $0x2f0] ss:$8 sps:$4 sm:$0xff]  }
  0x46   :  { %693 = vmatpush1.bf16.msra.mxu1 %v1488_v43  ;;  %v1541_v31 = vld [vmem:[%s1798_s3] sm:$0xff]   ;;  %v1547_v43 = vld [vmem:[%s1798_s3 + $0x18] sm:$0xff]   ;;  %v61_v62 = vld [vmem:[%s1795_s0 + $0x30] sm:$0xff] }
  0x47   :  { %694 = vmatprep.subr.bf16.mxu1 %v1489_v44  ;;  %v1548_v44 = vld [vmem:[%s1798_s3 + $0x60] sm:$0xff]   ;;  %v1553_v5 = vld [vmem:[%s1798_s3 + $0x30] sm:$0xff]  }
  0x48   :  { %740 = vmatpush1.bf16.msra.mxu0 %v1419_v23  ;;  %v1475_v23 = vld [vmem:[#allocation2 + $0x264] ss:$8 sps:$4 sm:$0xff]  }
  0x49   :  { %741 = vmatprep.subr.bf16.mxu0 %v1420_v26  ;;  %v62_v26 = vld [vmem:[%s1795_s0 + $0x38] sm:$0xff] }
  0x4a   :  { %695 = vmatpush1.bf16.msra.mxu1 %v1494_v47  ;;  %v1503_v47 = vld [vmem:[#allocation2 + $0x2b0] ss:$8 sps:$4 sm:$0xff]  }
  0x4b   :  { %696 = vmatprep.subr.bf16.mxu1 %v1495_v48  ;;  %v1511_v48 = vld [vmem:[#allocation2 + $0x2c4] ss:$8 sps:$4 sm:$0xff]  }
  0x4c   :  { %742 = vmatpush1.bf16.msra.mxu0 %v1422_v29  ;;  %v1481_v29 = vld [vmem:[#allocation2 + $0x274] ss:$8 sps:$4 sm:$0xff]  }
  0x4d   :  { %743 = vmatprep.subr.bf16.mxu0 %v1423_v30  ;;  %v69_v30 = vpack.c.bf16 %v62_v26, %v55_v25 }
  0x4e   :  { %697 = vmatpush1.bf16.msra.mxu1 %v1500_v51  ;;  %v1515_v51 = vld [vmem:[#allocation2 + $0x2d0] ss:$8 sps:$4 sm:$0xff]  }
  0x4f   :  { %698 = vmatprep.subr.bf16.mxu1 %v1501_v52  ;;  %v1523_v52 = vld [vmem:[#allocation2 + $0x2e4] ss:$8 sps:$4 sm:$0xff]  }
  0x50   :  { %744 = vmatpush1.bf16.msra.mxu0 %v1425_v33  ;;  %v1479_v33 = vld [vmem:[#allocation2 + $0x270] ss:$8 sps:$4 sm:$0xff]  }
  0x51   :  { %745 = vmatprep.subr.bf16.mxu0 %v1426_v34  ;;  %v1487_v34 = vld [vmem:[#allocation2 + $0x284] ss:$8 sps:$4 sm:$0xff]  }
  0x52   :  { %699 = vmatpush1.bf16.msra.mxu1 %v1506_v57  ;;  %v66_v57 = vld [vmem:[%s1795_s0 + $0x58] sm:$0xff] }
  0x53   :  { %700 = vmatprep.subr.bf16.mxu1 %v1507_v60  ;;  %v1533_v60 = vld [vmem:[#allocation2 + $0x300] ss:$8 sps:$4 sm:$0xff]  }
  0x54   :  { %746 = vmatpush1.bf16.msra.mxu0 %v1428_v37  ;;  %v1485_v37 = vld [vmem:[#allocation2 + $0x280] ss:$8 sps:$4 sm:$0xff]  }
  0x55   :  { %747 = vmatprep.subr.bf16.mxu0 %v1429_v38  ;;  %v1493_v38 = vld [vmem:[#allocation2 + $0x294] ss:$8 sps:$4 sm:$0xff]  }
  0x56   :  { %701 = vmatpush1.bf16.msra.mxu1 %v1512_v1  ;;  %v1549_v1 = vld [vmem:[%s1798_s3 + $0x20] sm:$0xff]  }
  0x57   :  { %702 = vmatprep.subr.bf16.mxu1 %v1513_v2  ;;  %v1550_v2 = vld [vmem:[%s1798_s3 + $0x68] sm:$0xff]  }
  0x58   :  { %748 = vmatpush1.bf16.msra.mxu0 %v1431_v41  ;;  %v1491_v41 = vld [vmem:[#allocation2 + $0x290] ss:$8 sps:$4 sm:$0xff]  }
  0x59   :  { %749 = vmatprep.subr.bf16.mxu0 %v1432_v42  ;;  %v1499_v42 = vld [vmem:[#allocation2 + $0x2a4] ss:$8 sps:$4 sm:$0xff]  }
  0x5a   :  { %703 = vmatpush1.bf16.msra.mxu1 %v1518_v7  ;;  %v1555_v7 = vld [vmem:[%s1798_s3 + $0x38] sm:$0xff]  }
  0x5b   :  { %704 = vmatprep.subr.bf16.mxu1 %v1519_v9 }
  0x5c   :  { %750 = vmatpush1.bf16.msra.mxu0 %v1434_v45  ;;  %v1497_v45 = vld [vmem:[#allocation2 + $0x2a0] ss:$8 sps:$4 sm:$0xff]  }
  0x5d   :  { %751 = vmatprep.subr.bf16.mxu0 %v1435_v46  ;;  %v1505_v46 = vld [vmem:[#allocation2 + $0x2b4] ss:$8 sps:$4 sm:$0xff]  }
  0x5e   :  { %705 = vmatpush1.bf16.msra.mxu1 %v1524_v12 }
  0x5f   :  { %706 = vmatprep.subr.bf16.mxu1 %v1525_v13  ;;  %v176_v13 = vlaneseq }
  0x60   :  { %752 = vmatpush1.bf16.msra.mxu0 %v1437_v49  ;;  %v1509_v49 = vld [vmem:[#allocation2 + $0x2c0] ss:$8 sps:$4 sm:$0xff]  }
  0x61   :  { %753 = vmatprep.subr.bf16.mxu0 %v1438_v50  ;;  %v1517_v50 = vld [vmem:[#allocation2 + $0x2d4] ss:$8 sps:$4 sm:$0xff]  }
  0x62   :  { %707 = vmatpush1.bf16.msra.mxu1 %v1530_v17 }
  0x63   :  { %708 = vmatprep.subr.bf16.mxu1 %v1531_v19 }
  0x64   :  { %754 = vmatpush1.bf16.msra.mxu0 %v1440_v53  ;;  %v1521_v53 = vld [vmem:[#allocation2 + $0x2e0] ss:$8 sps:$4 sm:$0xff]  }
  0x65   :  { %766 = vmatprep.subr.bf16.mxu0 %v1443_v56  ;;  %v59_v56 = vld [vmem:[%s1795_s0 + $0x20] sm:$0xff] }
  0x66   :  { %709 = vmatpush1.bf16.msra.mxu1 %v1536_v20 }
  0x67   :  { %756 = vmatmul.mubr.bf16.vlgmr.msra.gmra.mrb[0].mxu0 %v71_v59  ;;  %710 = vmatprep.subr.bf16.mxu1 %v1537_v21  ;;  %v73_v59 = vpack.c.bf16 %v66_v57, %v59_v56 }
  0x68   :  { %767 = vmatpush1.bf16.msra.mxu0 %v1441_v58  ;;  %798 = vmatprep.mubr.bf16.mxu0 %v74_v0  ;;  %v1535_v58 = vld [vmem:[#allocation2 + $0x304] ss:$8 sps:$4 sm:$0xff]  }
  0x69   :  { %768 = vmatprep.subr.bf16.mxu0 %v1446_v63  ;;  %v68_v63 = vld [vmem:[%s1795_s0 + $0x68] sm:$0xff] }
  0x6a   :  { %711 = vmatpush1.bf16.msra.mxu1 %v1539_v24  ;;  %v75_v0 = vpack.c.bf16 %v68_v63, %v61_v62 }
  0x6b   :  { %1317 = vmatprep.subr.bf16.mxu1 %v1540_v27 }
  0x6c   :  { %769 = vmatpush1.bf16.msra.mxu0 %v1444_v3  ;;  %v1551_v3 = vld [vmem:[%s1798_s3 + $0x28] sm:$0xff]  }
  0x6d   :  { %770 = vmatprep.subr.bf16.mxu0 %v1451_v4  ;;  %713 = vmatmul.mubr.bf16.vlgmr.msra.gmra.mrb[0].mxu1 %v69_v30  ;;  %v1552_v4 = vld [vmem:[%s1798_s3 + $0x70] sm:$0xff]  }
  0x6e   :  { %1318 = vmatpush3.bf16.msra.mxu1 %v1541_v31 }
  0x6f   :  { %1319 = vmatprep.subr.bf16.mxu1 %v1542_v32 }
  0x70   :  { %771 = vmatpush1.bf16.msra.mxu0 %v1449_v10 }
  0x71   :  { %772 = vmatprep.subr.bf16.mxu0 %v1457_v11 }
  0x72   :  { %1320 = vmatpush3.bf16.msra.mxu1 %v1543_v35 }
  0x73   :  { %1321 = vmatprep.subr.bf16.mxu1 %v1544_v36 }
  0x74   :  { %773 = vmatpush1.bf16.msra.mxu0 %v1455_v14  ;;  %v177_v14 = vshrl.u32 %v176_v13, 7 }
  0x75   :  { %774 = vmatprep.subr.bf16.mxu0 %v1463_v15 }
  0x76   :  { %1322 = vmatpush3.bf16.msra.mxu1 %v1545_v39  ;;  %v178_v15 = vsub.s32 0, %v177_v14  ;;  %v182_v17 = vsub.s32 1, %v177_v14  ;;  %v1557_v39 = vld [vmem:[#allocation4 + $0x8] sm:$0xff]  }
  0x77   :  { %1323 = vmatprep.subr.bf16.mxu1 %v1546_v40  ;;  %v1558_v40 = vld [vmem:[#allocation4 + $0x10] sm:$0xff]  }
  0x78   :  { %775 = vmatpush1.bf16.msra.mxu0 %v1461_v16  ;;  %v174_v16 = vld [vmem:[%s1797_s2] sm:$0x3] }
  0x79   :  { %776 = vmatprep.subr.bf16.mxu0 %v1469_v18  ;;  %v179_v18 = vrot.slane %v174_v16, %v178_v15  ;;  %v183_v19 = vrot.slane %v174_v16, %v182_v17 }
  0x7a   :  { %1324 = vmatpush3.bf16.msra.mxu1 %v1547_v43  ;;  %v1561_v43 = vld [vmem:[#allocation4 + $0x28] sm:$0xff]  }
  0x7b   :  { %1325 = vmatprep.subr.bf16.mxu1 %v1548_v44  ;;  %v1562_v44 = vld [vmem:[#allocation4 + $0x30] sm:$0xff]  }
  0x7c   :  { %777 = vmatpush1.bf16.msra.mxu0 %v1467_v22 }
  0x7d   :  { %778 = vmatprep.subr.bf16.mxu0 %v1475_v23 }
  0x7e   :  { %1326 = vmatpush3.bf16.msra.mxu1 %v1549_v1 }
  0x7f   :  { %1327 = vmatprep.subr.bf16.mxu1 %v1550_v2 }
  0x80   :  { %779 = vmatpush1.bf16.msra.mxu0 %v1473_v28 }
  0x81   :  { %780 = vmatprep.subr.bf16.mxu0 %v1481_v29 }
  0x82   :  { %1328 = vmatpush3.bf16.msra.mxu1 %v1551_v3 }
  0x83   :  { %1329 = vmatprep.subr.bf16.mxu1 %v1552_v4 }
  0x84   :  { %781 = vmatpush1.bf16.msra.mxu0 %v1479_v33 }
  0x85   :  { %782 = vmatprep.subr.bf16.mxu0 %v1487_v34 }
  0x86   :  { %1330 = vmatpush3.bf16.msra.mxu1 %v1553_v5 }
  0x87   :  { %1331 = vmatprep.subr.bf16.mxu1 %v1554_v6 }
  0x88   :  { %783 = vmatpush1.bf16.msra.mxu0 %v1485_v37 }
  0x89   :  { %784 = vmatprep.subr.bf16.mxu0 %v1493_v38  ;;  %v1556_v38 = vld [vmem:[#allocation4] sm:$0xff]  }
  0x8a   :  { %1332 = vmatpush3.bf16.msra.mxu1 %v1555_v7 }
  0x8b   :  { %1348 = vmatprep.subr.bf16.mxu1 %v1627_v8 }
  0x8c   :  { %785 = vmatpush1.bf16.msra.mxu0 %v1491_v41  ;;  %v1559_v41 = vld [vmem:[#allocation4 + $0x18] sm:$0xff]  }
  0x8d   :  { %786 = vmatprep.subr.bf16.mxu0 %v1499_v42  ;;  %v1560_v42 = vld [vmem:[#allocation4 + $0x20] sm:$0xff]  }
  0x90   :  { %787 = vmatpush1.bf16.msra.mxu0 %v1497_v45  ;;  %v1563_v45 = vld [vmem:[#allocation4 + $0x38] sm:$0xff]  }
  0x91   :  { %788 = vmatprep.subr.bf16.mxu0 %v1505_v46 }
  0x94   :  { %789 = vmatpush1.bf16.msra.mxu0 %v1503_v47  ;;  %v1282_v47 = vld [vmem:[%s1799_s4] ss:$0 sm:$0xff] }
  0x95   :  { %790 = vmatprep.subr.bf16.mxu0 %v1511_v48 }
  0x98   :  { %791 = vmatpush1.bf16.msra.mxu0 %v1509_v49 }
  0x99   :  { %792 = vmatprep.subr.bf16.mxu0 %v1517_v50 }
  0x9c   :  { %793 = vmatpush1.bf16.msra.mxu0 %v1515_v51 }
  0x9d   :  { %794 = vmatprep.subr.bf16.mxu0 %v1523_v52 }
  0xa0   :  { %795 = vmatpush1.bf16.msra.mxu0 %v1521_v53 }
  0xa1   :  { %796 = vmatprep.subr.bf16.mxu0 %v1529_v54 }
  0xa4   :  { %797 = vmatpush1.bf16.msra.mxu0 %v1527_v55 }
  0xa5   :  { %809 = vmatprep.subr.bf16.mxu0 %v1535_v58  ;;  %v1299_v58 = vld [vmem:[%s1801_s6] ss:$0 sm:$0xff] }
  0xa7   :  { %799 = vmatmul.mubr.bf16.vlgmr.msra.gmra.mrb[0].mxu0 %v73_v59 }
  0xa8   :  { %810 = vmatpush1.bf16.msra.mxu0 %v1533_v60  ;;  %841 = vmatprep.mubr.bf16.mxu0 %v1626_v61 }
  0xb3   :  { %1281 = vmatmul.mubr.msk.bf16.vlgmr.msra.gmra.mrb[0].mxu0 %vm676_vm0, %v75_v0 }
 0x140   :  { %v714_v9 = vpop.f32.mrb[0].mxu1 }
 0x141   :  { %v716_v10 = vpop.f32.mrb[1].mxu1  ;;  %v715_v20 = vadd.f32 %v714_v9, %v179_v18 }
 0x142   :  { %v718_v11 = vpop.f32.mrb[2].mxu1  ;;  %v717_v21 = vadd.f32 %v716_v10, %v183_v19 }
 0x143   :  { %v720_v12 = vpop.f32.mrb[3].mxu1  ;;  %v719_v23 = vadd.f32 %v718_v11, %v179_v18 }
 0x144   :  { %v721_v26 = vadd.f32 %v720_v12, %v183_v19 }
 0x186   :  { %v843_v22 = vpop.f32.mrb[0].mxu0 }
 0x187   :  { %v1369_v24 = vadd.f32 %v843_v22, %v715_v20  ;;  %v845_v25 = vpop.f32.mrb[1].mxu0 }
 0x188   :  { %v1371_v27 = vadd.f32 %v845_v25, %v717_v21  ;;  %v847_v28 = vpop.f32.mrb[2].mxu0 }
 0x189   :  { %v1373_v29 = vadd.f32 %v847_v28, %v719_v23  ;;  %v849_v30 = vpop.f32.mrb[3].mxu0  ;;  %v852_v32 = vmax.f32 %v1369_v24, 0.0 }
 0x18a   :  { %v1375_v31 = vadd.f32 %v849_v30, %v721_v26  ;;  %v853_v34 = vmax.f32 %v1371_v27, 0.0 }
 0x18b   :  { %v854_v33 = vmax.f32 %v1373_v29, 0.0 }
 0x18c   :  { %v855_v35 = vmax.f32 %v1375_v31, 0.0 }
 0x18d   :  { %v856_v36 = vpack.c.bf16 %v854_v33, %v852_v32 }
 0x18e   :  { %v857_v37 = vpack.c.bf16 %v855_v35, %v853_v34 }
 0x190   :  { %1025 = vmatprep.mubr.bf16.mxu1 %v857_v37 }
 0x191   :  { %1026 = vmatmul.mubr.bf16.vlgmr.msra.gmra.mrb[4].mxu1 %v856_v36 }
 0x192   :  { %1349 = vmatpush3.bf16.msra.mxu1 %v1556_v38  ;;  %1364 = vmatprep.mubr.msk.bf16.mxu1 %vm1628_vm1, %v1627_v8 }
 0x193   :  { %1350 = vmatprep.subr.bf16.mxu1 %v1627_v8 }
 0x196   :  { %1351 = vmatpush3.bf16.msra.mxu1 %v1557_v39 }
 0x197   :  { %1352 = vmatprep.subr.bf16.mxu1 %v1627_v8 }
 0x19a   :  { %1353 = vmatpush3.bf16.msra.mxu1 %v1558_v40 }
 0x19b   :  { %1354 = vmatprep.subr.bf16.mxu1 %v1627_v8 }
 0x19e   :  { %1355 = vmatpush3.bf16.msra.mxu1 %v1559_v41 }
 0x19f   :  { %1356 = vmatprep.subr.bf16.mxu1 %v1627_v8 }
 0x1a2   :  { %1357 = vmatpush3.bf16.msra.mxu1 %v1560_v42 }
 0x1a3   :  { %1358 = vmatprep.subr.bf16.mxu1 %v1627_v8 }
 0x1a6   :  { %1359 = vmatpush3.bf16.msra.mxu1 %v1561_v43 }
 0x1a7   :  { %1360 = vmatprep.subr.bf16.mxu1 %v1627_v8 }
 0x1aa   :  { %1361 = vmatpush3.bf16.msra.mxu1 %v1562_v44 }
 0x1ab   :  { %1362 = vmatprep.subr.bf16.mxu1 %v1627_v8 }
 0x1ae   :  { %1363 = vmatpush3.bf16.msra.mxu1 %v1563_v45 }
 0x264   :  { %v1333_v46 = vpop.f32.mrb[4].mxu1 }
 0x265   :  { %v1334_v48 = vpop.f32.mrb[5].mxu1 }
 0x266   :  { %v1335_v49 = vadd.f32 %v1334_v48, %v1333_v46  ;;  %v1336_v50 = vpop.f32.mrb[6].mxu1 }
 0x267   :  { %v1337_v51 = vpop.f32.mrb[7].mxu1 }
 0x268   :  { %v1028_v52 = vadd.f32 %v1335_v49, %v1282_v47  ;;  %v1338_v53 = vadd.f32 %v1337_v51, %v1336_v50 }
 0x26a   :  { %v1031_v54 = vadd.f32 %v1338_v53, %v1282_v47  ;;  %v1034_v55 = vmax.f32 %v1028_v52, 0.0 }
 0x26c   :  { %v1035_v56 = vmax.f32 %v1031_v54, 0.0 }
 0x26e   :  { %v1036_v57 = vpack.c.bf16 %v1035_v56, %v1034_v55 }
 0x270   :  { %1365 = vmatmul.mubr.bf16.vlgmr.msra.gmra.mrb[8].mxu1 %v1036_v57 }
 0x343   :  { %v1142_v59 = vpop.f32.mrb[8].mxu1 }
 0x344   :  { %v1143_v60 = vadd.f32 %v1299_v58, %v1142_v59  ;;  %v1366_v61 = vpop.f32.mrb[9].mxu1 }
 0x345   :  { %v1145_v62 = vpop.f32.mrb[10].mxu1 }
 0x346   :  { %1149 = vmax.xlane.f32.xlu0 %v1143_v60  ;;  %v1367_v63 = vpop.f32.mrb[11].mxu1  ;;  %v1146_v0 = vadd.f32 %v1299_v58, %v1145_v62 }
 0x34a   :  { %1151 = vmax.xlane.f32.xlu0 %v1146_v0 }
 0x3d3   :  { %v1150_v1 = vpop.xlane.xlu0 %1149 }
 0x3d4   :  { %v1153_v2 = vsub.f32 %v1143_v60, %v1150_v1 }
 0x3d6   :  { %v1155_v3 = vmul.f32 1.442695, %v1153_v2 }
 0x3d7   :  { %v1152_v4 = vpop.xlane.xlu0 %1151 }
 0x3d8   :  { %1564 = vpow2.f32 %v1155_v3  ;;  %v1154_v5 = vsub.f32 %v1146_v0, %v1152_v4 }
 0x3da   :  { %v1157_v6 = vmul.f32 1.442695, %v1154_v5 }
 0x3dc   :  { %1566 = vpow2.f32 %v1157_v6 }
 0x3e2   :  { %v1565_v7 = vpop.eup %1564 }
 0x3e3   :  { %1159 = vadd.xlane.f32.xlu1 %v1565_v7 }
 0x3e6   :  { %v1567_v8 = vpop.eup %1566 }
 0x3e7   :  { %1161 = vadd.xlane.f32.xlu1 %v1567_v8 }
 0x470   :  { %v1160_v9 = vpop.xlane.xlu1 %1159 }
 0x471   :  { %1568 = vrcp.f32 %v1160_v9 }
 0x474   :  { %v1162_v10 = vpop.xlane.xlu1 %1161 }
 0x475   :  { %1570 = vrcp.f32 %v1162_v10 }
 0x47b   :  { %v1569_v11 = vpop.eup %1568 }
 0x47c   :  { %v1164_v13 = vmul.f32 %v1569_v11, %v1565_v7 }
 0x47f   :  { %v1571_v12 = vpop.eup %1570 }
 0x480   :  { %v1166_v14 = vmul.f32 %v1571_v12, %v1567_v8 }
 0x482   :  { %v1315_v15 = vpack.c.bf16 %v1166_v14, %v1164_v13 }
 0x484   :  { %1316 = vst [vmem:[%s1802_s7] sm:$0xff] %v1315_v15  }
 0x485   :  { %1181 = vsyncpa [#allocation3], 1 }
 0x486   :  { %1182 = vsyncpa [#allocation5], 1 }

</bundles_post_ra>
